<compile_context>
chip_gen: v5e
topology: v5e:2x2
jax: 0.10.0
libtpu: 0.0.40
codegen_flags: <defaults>
</compile_context>

<pallas_src>
import functools

import jax
import jax.numpy as jnp
from jax import lax
from jax.experimental import pallas as pl
from jax.experimental.pallas import tpu as pltpu

# ---- config mirroring ICNN.__init__ -----------------------------------------
N_AGENTS = 4                  # args.n_agents
STATE_DIM = 16                # int(np.prod(args.state_shape))
EMBED_DIM = 32                # args.mixing_embed_dim (unused in forward)
HIDDEN = [32, 32, 32]         # hidden_layer_sizes
RANK = 1
N_LAYERS = len(HIDDEN) - 1    # 2

CHUNK = 256                   # lane strip-mine width inside the kernel


def icnn_kernel(x_ref, wcat_ref, bl_ref, w1_ref, w2_ref, o_ref, *, rank, h0, chunk):
    """ICNN forward for one batch tile, transposed (feature x batch) layout.

    x_ref   : (n_agents, TB)            agent_qs^T tile (batch on lanes)
    wcat_ref: (rank*h0 + h0, n_agents)  [Qd[0]^T; ...; Qd[rank-1]^T; Wl^T] fused
    bl_ref  : (h0, 1)                   ConvexQuadratic bias (column vector)
    w1_ref  : (h1, h0)                  I + wzz1^T  (residual folded in)
    w2_ref  : (h1, h1)                  I + ones(h1,1) @ wzz2^T (residual folded in)
    o_ref   : (h1, TB)                  z^T
    """
    # Hoist the tiny weights out of the lane-chunk loop (read refs once).
    wcat = wcat_ref[...]
    bias = bl_ref[...]
    w1 = w1_ref[...]
    w2 = w2_ref[...]

    n_chunks = o_ref.shape[-1] // chunk   # static

    def body(c, carry):
        off = pl.multiple_of(c * chunk, chunk)
        x = x_ref[:, pl.ds(off, chunk)]                                  # (4, C)

        # ---- z = quadratic_layers[0](agent_qs): one fused K=4 matmul --------
        y = jnp.dot(wcat, x, preferred_element_type=jnp.float32)        # (rank*h0+h0, C)
        yq = y[0:h0, :]
        quad = yq * yq
        for r in range(1, rank):                    # static; rank == 1 -> no loop
            t = y[r * h0:(r + 1) * h0, :]
            quad = quad + t * t
        z = quad + y[rank * h0:(rank + 1) * h0, :] + bias                # (h0, C)

        # ---- loop i = 0 .. nLayers (== 2), residuals folded into w1/w2 ------
        z = jnp.maximum(z, 0.0)                                          # i = 0
        z = jnp.maximum(jnp.dot(w1, z, preferred_element_type=jnp.float32), 0.0)  # i = 1
        z = jnp.dot(w2, z, preferred_element_type=jnp.float32)           # i = 2 (no relu)

        o_ref[:, pl.ds(off, chunk)] = z.astype(o_ref.dtype)
        return carry

    lax.fori_loop(0, n_chunks, body, 0, unroll=min(4, n_chunks))


def _round_up(x, m):
    return ((x + m - 1) // m) * m


@functools.partial(jax.jit, static_argnames=("tb", "out_dtype", "lane_major_output"))
def icnn_forward(agent_qs, states, params, *, tb=8192, out_dtype=jnp.float32,
                 lane_major_output=False):
    """Batch-tiled pallas_call; tiny weights stay VMEM-resident across grid steps."""
    del states  # the reference forward never uses `states`
    qd, wl, bl, wzz1, wzz2 = params
    rank, n_agents, h0 = qd.shape
    h1 = wzz1.shape[1]

    # ---- weight prep (tiny; f32 to keep parity with the f32 reference) ------
    qd_t = jnp.transpose(qd, (0, 2, 1)).reshape(rank * h0, n_agents)
    wcat = jnp.concatenate([qd_t, wl.T], axis=0).astype(jnp.float32)     # (rank*h0+h0, 4)
    bl_t = bl.reshape(h0, 1).astype(jnp.float32)                         # (h0, 1)
    # Fold the residual adds into the weights:
    #   z + wzz1^T z        == (I + wzz1^T) z
    #   z + 1_h1 (wzz2^T z) == (I + ones(h1,1) @ wzz2^T) z
    w1p = (jnp.eye(h1, h0, dtype=jnp.float32) + wzz1.T.astype(jnp.float32))          # (h1, h0)
    w2p = (jnp.eye(h1, dtype=jnp.float32)
           + jnp.ones((h1, 1), jnp.float32) @ wzz2.T.astype(jnp.float32))            # (h1, h1)

    # ---- batch tiling (lane axis) --------------------------------------------
    b = agent_qs.shape[0]
    tb = max(CHUNK, min(tb, _round_up(b, CHUNK)))
    # v7x megacore: keep >= 2 grid tiles when the batch is big enough to split.
    if b > 2 * CHUNK and _round_up(b, tb) // tb < 2:
        tb = _round_up((b + 1) // 2, CHUNK)
    b_pad = _round_up(b, tb)

    x_t = agent_qs.astype(jnp.float32).T                 # (n_agents, B), batch on lanes
    if b_pad != b:
        x_t = jnp.pad(x_t, ((0, 0), (0, b_pad - b)))     # zero cols are benign, sliced off

    kernel = functools.partial(icnn_kernel, rank=rank, h0=h0, chunk=CHUNK)
    out_t = pl.pallas_call(
        kernel,
        out_shape=jax.ShapeDtypeStruct((h1, b_pad), out_dtype),
        grid=(b_pad // tb,),
        in_specs=[
            # Batch tile of agent_qs^T.  Add pipeline_mode=pl.Buffered(3) only if
            # profiling shows exposed input DMA (costs VMEM; matters on v7x).
            pl.BlockSpec((n_agents, tb), lambda i: (0, i)),
            # Tiny weights: constant block index -> VMEM-resident, no per-step DMA.
            pl.BlockSpec(wcat.shape, lambda i: (0, 0)),
            pl.BlockSpec(bl_t.shape, lambda i: (0, 0)),
            pl.BlockSpec(w1p.shape, lambda i: (0, 0)),
            pl.BlockSpec(w2p.shape, lambda i: (0, 0)),
        ],
        out_specs=pl.BlockSpec((h1, tb), lambda i: (0, i)),
        compiler_params=pltpu.CompilerParams(
            dimension_semantics=("parallel",),            # shard batch tiles across TCs
            vmem_limit_bytes=32 * 1024 * 1024,            # stay <= 32 MiB (v7x: 64 MiB/TC)
        ),
    )(x_t, wcat, bl_t, w1p, w2p)

    if lane_major_output:
        # Lane-dense (h1, B) layout: no wrapper transpose of the dominant output
        # stream.  Downstream consumers may also take the padded (h1, b_pad) slab.
        return out_t[:, :b]
    # Module-native (B, h1) layout; transpose handled by XLA outside the kernel.
    return out_t[:, :b].T                                 # (B, h1) == (B, 32)


def icnn_reference(agent_qs, params):
    """Pure-JAX reference with identical semantics (for validation)."""
    qd, wl, bl, wzz1, wzz2 = params
    x = agent_qs
    quad = jnp.sum(jnp.einsum("bi,rio->rbo", x, qd) ** 2, axis=0)
    z = quad + x @ wl + bl
    z = jnp.maximum(z, 0.0)
    z = z + z @ wzz1
    z = jnp.maximum(z, 0.0)
    z = z + z @ wzz2
    return z


def init_params(key):
    k_qd, k_wl, k_bl, k_z1, k_z2 = jax.random.split(key, 5)
    # ConvexQuadratic(n_agents -> 32, rank=1, bias=True)
    qd = jax.random.normal(k_qd, (RANK, N_AGENTS, HIDDEN[0]), jnp.float32)
    wl = jax.random.normal(k_wl, (N_AGENTS, HIDDEN[0]), jnp.float32) / jnp.sqrt(N_AGENTS)
    bl = jax.random.normal(k_bl, (1, HIDDEN[0]), jnp.float32) * 0.1
    # In-forward Linear(32, 32, bias=False) and Linear(32, 1, bias=False)
    wzz1 = jax.random.normal(k_z1, (HIDDEN[0], HIDDEN[1]), jnp.float32) / jnp.sqrt(HIDDEN[0])
    wzz2 = jax.random.normal(k_z2, (HIDDEN[1], 1), jnp.float32) / jnp.sqrt(HIDDEN[1])
    return qd, wl, bl, wzz1, wzz2


if __name__ == "__main__":
    key = jax.random.PRNGKey(0)
    k_x, k_s, k_p = jax.random.split(key, 3)

    B = 8  # e.g. batch * seq flattened
    agent_qs = jax.random.normal(k_x, (B, N_AGENTS), jnp.float32)
    states = jax.random.normal(k_s, (B, STATE_DIM), jnp.float32)  # unused by forward
    params = init_params(k_p)

    ref = icnn_reference(agent_qs, params)

    # 1) Module-native (B, 32) f32 output.
    out = jax.block_until_ready(icnn_forward(agent_qs, states, params))
    assert out.shape == (B, HIDDEN[-1]) and out.dtype == jnp.float32
    assert jnp.allclose(out, ref, rtol=1e-3, atol=5e-3), float(jnp.max(jnp.abs(out - ref)))

    # 2) Lane-dense (32, B) f32 output — skips the wrapper output transpose.
    out_lm = jax.block_until_ready(
        icnn_forward(agent_qs, states, params, lane_major_output=True))
    assert out_lm.shape == (HIDDEN[-1], B)
    assert jnp.allclose(out_lm, ref.T, rtol=1e-3, atol=5e-3)

    # 3) bf16 output (f32 accumulation in-kernel) — halves the dominant HBM write.
    out_bf16 = jax.block_until_ready(
        icnn_forward(agent_qs, states, params, out_dtype=jnp.bfloat16))
    assert out_bf16.dtype == jnp.bfloat16
    scale = float(jnp.maximum(jnp.max(jnp.abs(ref)), 1.0))
    rel = float(jnp.max(jnp.abs(out_bf16.astype(jnp.float32) - ref))) / scale
    assert rel < 2e-2, rel

    print("KERNEL_OK")
</pallas_src>

<mosaic_0001>
module attributes {stable_mosaic.version = 11 : i64} {
  func.func @icnn_kernel(%arg0: i32, %arg1: memref<4x256xf32, #tpu.memory_space<vmem>>, %arg2: memref<64x4xf32, #tpu.memory_space<vmem>>, %arg3: memref<32x1xf32, #tpu.memory_space<vmem>>, %arg4: memref<32x32xf32, #tpu.memory_space<vmem>>, %arg5: memref<32x32xf32, #tpu.memory_space<vmem>>, %arg6: memref<32x256xf32, #tpu.memory_space<vmem>>) attributes {dimension_semantics = [#tpu.dimension_semantics<parallel>], iteration_bounds = array<i64: 1>, scalar_prefetch = 0 : i64, scratch_operands = 0 : i64, tpu.core_type = #tpu.core_type<tc>, window_params = [{transform_indices = @transform_0, window_bounds = array<i64: 4, 256>}, {pipeline_mode = #tpu.pipeline_mode<synchronous>, transform_indices = @transform_1, window_bounds = array<i64: 64, 4>}, {pipeline_mode = #tpu.pipeline_mode<synchronous>, transform_indices = @transform_2, window_bounds = array<i64: 32, 1>}, {pipeline_mode = #tpu.pipeline_mode<synchronous>, transform_indices = @transform_3, window_bounds = array<i64: 32, 32>}, {pipeline_mode = #tpu.pipeline_mode<synchronous>, transform_indices = @transform_4, window_bounds = array<i64: 32, 32>}, {transform_indices = @transform_5, window_bounds = array<i64: 32, 256>}]} {
    %c0 = arith.constant 0 : index
    %c0_0 = arith.constant 0 : index
    %0 = vector.load %arg2[%c0, %c0_0] : memref<64x4xf32, #tpu.memory_space<vmem>>, vector<64x4xf32>
    %c0_1 = arith.constant 0 : index
    %c0_2 = arith.constant 0 : index
    %1 = vector.load %arg3[%c0_1, %c0_2] : memref<32x1xf32, #tpu.memory_space<vmem>>, vector<32x1xf32>
    %c0_3 = arith.constant 0 : index
    %c0_4 = arith.constant 0 : index
    %2 = vector.load %arg4[%c0_3, %c0_4] : memref<32x32xf32, #tpu.memory_space<vmem>>, vector<32x32xf32>
    %c0_5 = arith.constant 0 : index
    %c0_6 = arith.constant 0 : index
    %3 = vector.load %arg5[%c0_5, %c0_6] : memref<32x32xf32, #tpu.memory_space<vmem>>, vector<32x32xf32>
    %c0_i32 = arith.constant 0 : i32
    %c256_i32 = arith.constant 256 : i32
    %4 = arith.muli %c0_i32, %c256_i32 : i32
    %5 = tpu.assume_multiple %4, 256 : i32
    %c0_7 = arith.constant 0 : index
    %6 = arith.index_cast %5 : i32 to index
    %7 = vector.load %arg1[%c0_7, %6] : memref<4x256xf32, #tpu.memory_space<vmem>>, vector<4x256xf32>
    %cst = arith.constant dense<0.000000e+00> : vector<64x256xf32>
    %8 = tpu.matmul %0, %7, %cst {dimension_numbers = #tpu.dot_dimension_numbers<[1], [0], [0], [1], [0, 0, 1, 1], [], []>} : vector<64x4xf32>, vector<4x256xf32>, vector<64x256xf32> -> vector<64x256xf32>
    %9 = vector.extract_strided_slice %8 {offsets = [0, 0], sizes = [32, 256], strides = [1, 1]} : vector<64x256xf32> to vector<32x256xf32>
    %10 = arith.mulf %9, %9 : vector<32x256xf32>
    %11 = vector.extract_strided_slice %8 {offsets = [32, 0], sizes = [32, 256], strides = [1, 1]} : vector<64x256xf32> to vector<32x256xf32>
    %12 = arith.addf %10, %11 : vector<32x256xf32>
    %13 = vector.broadcast %1 : vector<32x1xf32> to vector<32x256xf32>
    %14 = arith.addf %12, %13 : vector<32x256xf32>
    %cst_8 = arith.constant 0.000000e+00 : f32
    %15 = vector.broadcast %cst_8 : f32 to vector<32x256xf32>
    %16 = arith.maximumf %14, %15 : vector<32x256xf32>
    %cst_9 = arith.constant dense<0.000000e+00> : vector<32x256xf32>
    %17 = tpu.matmul %2, %16, %cst_9 {dimension_numbers = #tpu.dot_dimension_numbers<[1], [0], [0], [1], [0, 0, 1, 1], [], []>} : vector<32x32xf32>, vector<32x256xf32>, vector<32x256xf32> -> vector<32x256xf32>
    %cst_10 = arith.constant 0.000000e+00 : f32
    %18 = vector.broadcast %cst_10 : f32 to vector<32x256xf32>
    %19 = arith.maximumf %17, %18 : vector<32x256xf32>
    %cst_11 = arith.constant dense<0.000000e+00> : vector<32x256xf32>
    %20 = tpu.matmul %3, %19, %cst_11 {dimension_numbers = #tpu.dot_dimension_numbers<[1], [0], [0], [1], [0, 0, 1, 1], [], []>} : vector<32x32xf32>, vector<32x256xf32>, vector<32x256xf32> -> vector<32x256xf32>
    %c0_12 = arith.constant 0 : index
    %21 = arith.index_cast %5 : i32 to index
    %22 = vector.load %arg6[%c0_12, %21] : memref<32x256xf32, #tpu.memory_space<vmem>>, vector<32x256xf32>
    tpu.vector_store %arg6[%c0_12, %21], %20 {strides = array<i32>} : memref<32x256xf32, #tpu.memory_space<vmem>>, vector<32x256xf32>,
    %c1_i32 = arith.constant 1 : i32
    return
  }
  func.func @transform_0(%arg0: i32) -> (i32, i32) {
    %c0_i32 = arith.constant 0 : i32
    %c0_i32_0 = arith.constant 0 : i32
    return %c0_i32, %arg0 : i32, i32
  }
  func.func @transform_1(%arg0: i32) -> (i32, i32) {
    %c0_i32 = arith.constant 0 : i32
    %c0_i32_0 = arith.constant 0 : i32
    %c0_i32_1 = arith.constant 0 : i32
    return %c0_i32, %c0_i32_0 : i32, i32
  }
  func.func @transform_2(%arg0: i32) -> (i32, i32) {
    %c0_i32 = arith.constant 0 : i32
    %c0_i32_0 = arith.constant 0 : i32
    %c0_i32_1 = arith.constant 0 : i32
    return %c0_i32, %c0_i32_0 : i32, i32
  }
  func.func @transform_3(%arg0: i32) -> (i32, i32) {
    %c0_i32 = arith.constant 0 : i32
    %c0_i32_0 = arith.constant 0 : i32
    %c0_i32_1 = arith.constant 0 : i32
    return %c0_i32, %c0_i32_0 : i32, i32
  }
  func.func @transform_4(%arg0: i32) -> (i32, i32) {
    %c0_i32 = arith.constant 0 : i32
    %c0_i32_0 = arith.constant 0 : i32
    %c0_i32_1 = arith.constant 0 : i32
    return %c0_i32, %c0_i32_0 : i32, i32
  }
  func.func @transform_5(%arg0: i32) -> (i32, i32) {
    %c0_i32 = arith.constant 0 : i32
    %c0_i32_0 = arith.constant 0 : i32
    return %c0_i32, %arg0 : i32, i32
  }
}

</mosaic_0001>

<bundles_post_ra>
// kernel: icnn_forward.1
= control target key start
LH: loop header
LB: loop body
LE: loop exit
PB: predicated region body
PF: predicated region fallthrough
CT: control target
= control target key end

     0   :  { %vm70_vm0 = vcmask 1043456   ;;  %vm45_vm1 = vcmask 31744   ;;  %v407_v5 = vmov 0   ;;  %vm209_vm2 = vcmask 261120   ;;  %s557_s0 = inlined_call_operand.vmem [shape: f32[4,256], index: 0, kind: input, shape index: {}]   ;;  %s558_s1 = inlined_call_operand.vmem [shape: f32[64,4], index: 1, kind: input, shape index: {}]   ;;  %s559_s2 = inlined_call_operand.vmem [shape: f32[32,1], index: 2, kind: input, shape index: {}]   ;;  %s560_s3 = inlined_call_operand.vmem [shape: f32[32,32], index: 3, kind: input, shape index: {}]   ;;  %s561_s4 = inlined_call_operand.vmem [shape: f32[32,32], index: 4, kind: input, shape index: {}]   ;;  %s562_s5 = inlined_call_operand.vmem [shape: f32[32,256], index: 5, kind: output, shape index: {}]  }
   0x1   :  { %v40_v0 = vld [vmem:[%s557_s0] sm:$0xff]  ;;  %v29_v4 = vld [vmem:[%s559_s2 + $0x8] sm:$0xff]  ;;  %406 = vset.pattern.permute.xlu1 %v407_v5  ;;  %405 = vset.pattern.permute.xlu0 %v407_v5  ;;  %v22_v8 = vld [vmem:[%s558_s1 + $0x10] sm:$0xff] }
   0x2   :  { %42 = vst [vmem:[#allocation1] ss:$2 sm:$0xff] %v40_v0  ;;  %v20_v1 = vld [vmem:[%s558_s1] sm:$0xff]  ;;  %180 = vperm.xlu1 %406, %v29_v4   ;;  %v21_v6 = vld [vmem:[%s558_s1 + $0x8] sm:$0xff]  ;;  %v31_v9 = vld [vmem:[%s559_s2 + $0x18] sm:$0xff] }
   0x3   :  { %v28_v7 = vld [vmem:[%s559_s2] sm:$0xff]  ;;  %190 = vperm.xlu0 %405, %v31_v9   ;;  %v23_v10 = vld [vmem:[%s558_s1 + $0x18] sm:$0xff]  ;;  %v30_v11 = vld [vmem:[%s559_s2 + $0x10] sm:$0xff] }
   0x4   :  { %v24_v12 = vld [vmem:[%s558_s1 + $0x20] sm:$0xff]  ;;  %v25_v13 = vld [vmem:[%s558_s1 + $0x28] sm:$0xff]  ;;  %v26_v14 = vld [vmem:[%s558_s1 + $0x30] sm:$0xff] }
   0x5   :  { %v27_v15 = vld [vmem:[%s558_s1 + $0x38] sm:$0xff]  ;;  %v32_v4 = vld [vmem:[%s560_s3] sm:$0xff]  ;;  %v33_v5 = vld [vmem:[%s560_s3 + $0x8] sm:$0xff] }
   0x9   :  { %v43_v2 = vld.sshfl [vmem:[#allocation1] sm:$0xff pattern:$0x75316420]  ;;  %v44_v3 = vld.sshfl [vmem:[#allocation1 + $0x8] sm:$0xff pattern:$0x75316420] }
   0xa   :  { %370 = vmatpush.msk.msra.mxu0 %vm70_vm0, %v43_v2  ;;  %379 = vmatpush.msk.msra.mxu1 %vm70_vm0, %v44_v3 }
   0xb   :  { %371 = vmatmul.msk.f32.vlgmr.msra.gmra.mxu0 %vm45_vm1, %v20_v1  ;;  %380 = vmatmul.msk.f32.vlgmr.msra.gmra.mxu1 %vm45_vm1, %v20_v1 }
   0xc   :  { %175 = vperm.xlu1 %406, %v28_v7   ;;  %185 = vperm.xlu0 %405, %v30_v11   ;;  %v35_v7 = vld [vmem:[%s560_s3 + $0x18] sm:$0xff] }
  0x13   :  { %372 = vmatmul.msk.f32.gmra.mxu0 %vm45_vm1, %v21_v6  ;;  %381 = vmatmul.msk.f32.gmra.mxu1 %vm45_vm1, %v21_v6  ;;  %v34_v6 = vld [vmem:[%s560_s3 + $0x10] sm:$0xff] }
  0x1b   :  { %373 = vmatmul.msk.f32.gmra.mxu0 %vm45_vm1, %v22_v8  ;;  %382 = vmatmul.msk.f32.gmra.mxu1 %vm45_vm1, %v22_v8 }
  0x23   :  { %374 = vmatmul.msk.f32.gmra.mxu0 %vm45_vm1, %v23_v10  ;;  %383 = vmatmul.msk.f32.gmra.mxu1 %vm45_vm1, %v23_v10 }
  0x2b   :  { %375 = vmatmul.msk.f32.gmra.mxu0 %vm45_vm1, %v24_v12  ;;  %384 = vmatmul.msk.f32.gmra.mxu1 %vm45_vm1, %v24_v12 }
  0x33   :  { %376 = vmatmul.msk.f32.gmra.mxu0 %vm45_vm1, %v25_v13  ;;  %385 = vmatmul.msk.f32.gmra.mxu1 %vm45_vm1, %v25_v13 }
  0x3b   :  { %377 = vmatmul.msk.f32.gmra.mxu0 %vm45_vm1, %v26_v14  ;;  %386 = vmatmul.msk.f32.gmra.mxu1 %vm45_vm1, %v26_v14 }
  0x43   :  { %378 = vmatmul.msk.f32.gmra.mxu0 %vm45_vm1, %v27_v15  ;;  %387 = vmatmul.msk.f32.gmra.mxu1 %vm45_vm1, %v27_v15 }
  0x74   :  { %v181_v31 = vpop.permute.xlu1 %180 }
  0x75   :  { %v191_v28 = vpop.permute.xlu0 %190 }
  0x7e   :  { %v186_v40 = vpop.permute.xlu0 %185  ;;  %v176_v55 = vpop.permute.xlu1 %175 }
  0x88   :  { %v92_v16 = vpop.f32.mrf.mxu0  ;;  %v133_v17 = vpop.f32.mrf.mxu1 }
  0x89   :  { %v157_v41 = vmul.f32 %v92_v16, %v92_v16  ;;  %v158_v42 = vmul.f32 %v133_v17, %v133_v17 }
  0x90   :  { %v95_v18 = vpop.f32.mrf.mxu0  ;;  %v136_v19 = vpop.f32.mrf.mxu1 }
  0x91   :  { %v159_v34 = vmul.f32 %v95_v18, %v95_v18  ;;  %v160_v35 = vmul.f32 %v136_v19, %v136_v19 }
  0x98   :  { %v98_v20 = vpop.f32.mrf.mxu0  ;;  %v139_v21 = vpop.f32.mrf.mxu1 }
  0x99   :  { %v161_v32 = vmul.f32 %v98_v20, %v98_v20  ;;  %v162_v33 = vmul.f32 %v139_v21, %v139_v21 }
  0xa0   :  { %v101_v22 = vpop.f32.mrf.mxu0  ;;  %v142_v23 = vpop.f32.mrf.mxu1 }
  0xa1   :  { %v163_v36 = vmul.f32 %v101_v22, %v101_v22  ;;  %v164_v37 = vmul.f32 %v142_v23, %v142_v23 }
  0xa8   :  { %v104_v24 = vpop.f32.mrf.mxu0  ;;  %v145_v25 = vpop.f32.mrf.mxu1 }
  0xa9   :  { %v165_v49 = vadd.f32 %v157_v41, %v104_v24  ;;  %v166_v50 = vadd.f32 %v158_v42, %v145_v25  ;;  %v36_v24 = vld [vmem:[%s561_s4] sm:$0xff]  ;;  %v37_v25 = vld [vmem:[%s561_s4 + $0x8] sm:$0xff] }
  0xab   :  { %v193_v60 = vadd.f32 %v176_v55, %v165_v49  ;;  %v194_v61 = vadd.f32 %v176_v55, %v166_v50 }
  0xad   :  { %v201_v2 = vmax.f32 %v193_v60, 0.0  ;;  %v202_v3 = vmax.f32 %v194_v61, 0.0 }
  0xb0   :  { %v107_v26 = vpop.f32.mrf.mxu0  ;;  %v148_v27 = vpop.f32.mrf.mxu1 }
  0xb1   :  { %v167_v45 = vadd.f32 %v159_v34, %v107_v26  ;;  %v168_v46 = vadd.f32 %v160_v35, %v148_v27  ;;  %v38_v26 = vld [vmem:[%s561_s4 + $0x10] sm:$0xff]  ;;  %v39_v27 = vld [vmem:[%s561_s4 + $0x18] sm:$0xff] }
  0xb3   :  { %v195_v58 = vadd.f32 %v181_v31, %v167_v45  ;;  %v196_v59 = vadd.f32 %v181_v31, %v168_v46 }
  0xb5   :  { %v203_v0 = vmax.f32 %v195_v58, 0.0  ;;  %v204_v1 = vmax.f32 %v196_v59, 0.0 }
  0xb8   :  { %v110_v29 = vpop.f32.mrf.mxu0  ;;  %v151_v30 = vpop.f32.mrf.mxu1 }
  0xb9   :  { %v169_v38 = vadd.f32 %v161_v32, %v110_v29  ;;  %v170_v39 = vadd.f32 %v162_v33, %v151_v30 }
  0xbb   :  { %v197_v51 = vadd.f32 %v186_v40, %v169_v38  ;;  %v198_v52 = vadd.f32 %v186_v40, %v170_v39 }
  0xbd   :  { %v205_v62 = vmax.f32 %v197_v51, 0.0  ;;  %v206_v63 = vmax.f32 %v198_v52, 0.0 }
  0xc0   :  { %v113_v43 = vpop.f32.mrf.mxu0  ;;  %v154_v44 = vpop.f32.mrf.mxu1 }
  0xc1   :  { %v171_v47 = vadd.f32 %v163_v36, %v113_v43  ;;  %v172_v48 = vadd.f32 %v164_v37, %v154_v44 }
  0xc3   :  { %v199_v53 = vadd.f32 %v191_v28, %v171_v47  ;;  %v200_v54 = vadd.f32 %v191_v28, %v172_v48 }
  0xc5   :  { %v207_v56 = vmax.f32 %v199_v53, 0.0  ;;  %v208_v57 = vmax.f32 %v200_v54, 0.0 }
  0xc7   :  { %234 = vmatpush.msra.mxu2 %v207_v56  ;;  %263 = vmatpush.msra.mxu3 %v208_v57 }
  0xc9   :  { %235 = vmatpush.msra.mxu2 %v205_v62  ;;  %264 = vmatpush.msra.mxu3 %v206_v63 }
  0xcb   :  { %236 = vmatpush.msra.mxu2 %v203_v0  ;;  %265 = vmatpush.msra.mxu3 %v204_v1 }
  0xcd   :  { %237 = vmatpush.msra.mxu2 %v201_v2  ;;  %266 = vmatpush.msra.mxu3 %v202_v3 }
  0xce   :  { %388 = vmatmul.msk.f32.vlgmr.msra.gmra.mxu2 %vm209_vm2, %v32_v4  ;;  %392 = vmatmul.msk.f32.vlgmr.msra.gmra.mxu3 %vm209_vm2, %v32_v4 }
  0xd6   :  { %389 = vmatmul.msk.f32.gmra.mxu2 %vm209_vm2, %v33_v5  ;;  %393 = vmatmul.msk.f32.gmra.mxu3 %vm209_vm2, %v33_v5 }
  0xde   :  { %390 = vmatmul.msk.f32.gmra.mxu2 %vm209_vm2, %v34_v6  ;;  %394 = vmatmul.msk.f32.gmra.mxu3 %vm209_vm2, %v34_v6 }
  0xe6   :  { %391 = vmatmul.msk.f32.gmra.mxu2 %vm209_vm2, %v35_v7  ;;  %395 = vmatmul.msk.f32.gmra.mxu3 %vm209_vm2, %v35_v7 }
 0x151   :  { %v239_v8 = vpop.f32.mrf.mxu2  ;;  %v268_v9 = vpop.f32.mrf.mxu3 }
 0x152   :  { %v280_v22 = vmax.f32 %v239_v8, 0.0  ;;  %v281_v23 = vmax.f32 %v268_v9, 0.0 }
 0x159   :  { %v242_v10 = vpop.f32.mrf.mxu2  ;;  %v271_v11 = vpop.f32.mrf.mxu3 }
 0x15a   :  { %v282_v20 = vmax.f32 %v242_v10, 0.0  ;;  %v283_v21 = vmax.f32 %v271_v11, 0.0 }
 0x161   :  { %v245_v12 = vpop.f32.mrf.mxu2  ;;  %v274_v13 = vpop.f32.mrf.mxu3 }
 0x162   :  { %v284_v18 = vmax.f32 %v245_v12, 0.0  ;;  %v285_v19 = vmax.f32 %v274_v13, 0.0 }
 0x169   :  { %v248_v14 = vpop.f32.mrf.mxu2  ;;  %v277_v15 = vpop.f32.mrf.mxu3 }
 0x16a   :  { %v286_v16 = vmax.f32 %v248_v14, 0.0  ;;  %v287_v17 = vmax.f32 %v277_v15, 0.0 }
 0x16c   :  { %312 = vmatpush.msrb.mxu2 %v286_v16  ;;  %341 = vmatpush.msrb.mxu3 %v287_v17 }
 0x16e   :  { %313 = vmatpush.msrb.mxu2 %v284_v18  ;;  %342 = vmatpush.msrb.mxu3 %v285_v19 }
 0x170   :  { %314 = vmatpush.msrb.mxu2 %v282_v20  ;;  %343 = vmatpush.msrb.mxu3 %v283_v21 }
 0x172   :  { %315 = vmatpush.msrb.mxu2 %v280_v22  ;;  %344 = vmatpush.msrb.mxu3 %v281_v23 }
 0x173   :  { %396 = vmatmul.msk.f32.vlgmr.msrb.gmra.mxu2 %vm209_vm2, %v36_v24  ;;  %400 = vmatmul.msk.f32.vlgmr.msrb.gmra.mxu3 %vm209_vm2, %v36_v24 }
 0x17b   :  { %397 = vmatmul.msk.f32.gmra.mxu2 %vm209_vm2, %v37_v25  ;;  %401 = vmatmul.msk.f32.gmra.mxu3 %vm209_vm2, %v37_v25 }
 0x183   :  { %398 = vmatmul.msk.f32.gmra.mxu2 %vm209_vm2, %v38_v26  ;;  %402 = vmatmul.msk.f32.gmra.mxu3 %vm209_vm2, %v38_v26 }
 0x18b   :  { %399 = vmatmul.msk.f32.gmra.mxu2 %vm209_vm2, %v39_v27  ;;  %403 = vmatmul.msk.f32.gmra.mxu3 %vm209_vm2, %v39_v27 }
 0x1f6   :  { %v317_v28 = vpop.f32.mrf.mxu2  ;;  %v346_v29 = vpop.f32.mrf.mxu3 }
 0x1f7   :  { %358 = vst [vmem:[%s562_s5] sm:$0xff] %v317_v28 }
 0x1f8   :  { %359 = vst [vmem:[%s562_s5 + $0x8] sm:$0xff] %v346_v29 }
 0x1fe   :  { %v320_v30 = vpop.f32.mrf.mxu2  ;;  %v349_v31 = vpop.f32.mrf.mxu3 }
 0x1ff   :  { %360 = vst [vmem:[%s562_s5 + $0x10] sm:$0xff] %v320_v30 }
 0x200   :  { %361 = vst [vmem:[%s562_s5 + $0x18] sm:$0xff] %v349_v31 }
 0x206   :  { %v323_v32 = vpop.f32.mrf.mxu2  ;;  %v352_v33 = vpop.f32.mrf.mxu3 }
 0x207   :  { %362 = vst [vmem:[%s562_s5 + $0x20] sm:$0xff] %v323_v32 }
 0x208   :  { %363 = vst [vmem:[%s562_s5 + $0x28] sm:$0xff] %v352_v33 }
 0x20e   :  { %v326_v34 = vpop.f32.mrf.mxu2  ;;  %v355_v35 = vpop.f32.mrf.mxu3 }
 0x20f   :  { %364 = vst [vmem:[%s562_s5 + $0x30] sm:$0xff] %v326_v34 }
 0x210   :  { %365 = vst [vmem:[%s562_s5 + $0x38] sm:$0xff] %v355_v35 }

</bundles_post_ra>
